<compile_context>
chip_gen: v7x
topology: tpu7x:2x2x1
jax: 0.10.0
libtpu: 0.0.40
codegen_flags: <defaults>
</compile_context>

<pallas_src>
import jax
import jax.numpy as jnp
from jax.experimental import pallas as pl
from jax.experimental.pallas import tpu as pltpu


def _round_up(x, m):
    return ((x + m - 1) // m) * m


def _vnet_kernel(obs_ref, w1_ref, b1_ref, w2_ref, b2_ref, w3_ref, b3_ref, out_ref):
    # (tile_b, obs_dim) @ (obs_dim, h0p) on the MXU, f32 accumulation.
    x = obs_ref[...]
    h = jnp.dot(x, w1_ref[...], preferred_element_type=jnp.float32)
    h = jnp.maximum(h + b1_ref[...], 0.0)                        # f32 bias + ReLU (VPU)

    h = jnp.dot(h.astype(w2_ref.dtype), w2_ref[...],
                preferred_element_type=jnp.float32)
    h = jnp.maximum(h + b2_ref[...], 0.0)                        # (tile_b, h1p) f32

    # Value head (out_features == 1): VPU multiply + lane reduction instead of
    # an N=1 MXU matmul. b3 is a scalar read from SMEM.
    v = jnp.sum(h * w3_ref[...], axis=-1) + b3_ref[0]            # (tile_b,) f32
    # Lane-dense store: one (1, tile_b) row per grid step (unmasked vst).
    out_ref[...] = v[None, :].astype(out_ref.dtype)


def vnet_forward(obs, params, *, block_b=1024, compute_dtype=None):
    """VNet forward. obs: (B, obs_dim) -> (B,) float32 values.

    compute_dtype: dtype fed to the MXU matmuls (None -> float32). Use
    jnp.bfloat16 on v6e/v7x to halve HBM traffic on the obs stream; all
    accumulation / elementwise math stays f32.
    """
    w1, b1, w2, b2, w3_row, b3 = params
    B, obs_dim = obs.shape
    h0p = w1.shape[1]
    h1p = w2.shape[1]
    if compute_dtype is None:
        compute_dtype = jnp.float32

    # Batch tile: multiple of 128 (lane-dense output rows), capped by block_b.
    tile_b = int(min(block_b, _round_up(B, 128)))
    tile_b = _round_up(tile_b, 128)
    padded_b = _round_up(B, tile_b)
    num_tiles = padded_b // tile_b

    obs_c = obs.astype(compute_dtype)
    if padded_b != B:
        obs_c = jnp.pad(obs_c, ((0, padded_b - B), (0, 0)))
    w1_c = w1.astype(compute_dtype)
    w2_c = w2.astype(compute_dtype)

    itemsize = jnp.dtype(compute_dtype).itemsize
    cost = pl.CostEstimate(
        flops=2 * padded_b * (obs_dim * h0p + h0p * h1p + h1p),
        transcendentals=0,
        bytes_accessed=(padded_b * obs_dim * itemsize           # obs stream (dominant)
                        + padded_b * 4                          # output
                        + (obs_dim * h0p + h0p * h1p) * itemsize
                        + (h0p + 3 * h1p + 1) * 4),             # biases + W3 row
    )

    out2d = pl.pallas_call(
        _vnet_kernel,
        out_shape=jax.ShapeDtypeStruct((num_tiles, tile_b), jnp.float32),
        grid_spec=pltpu.PrefetchScalarGridSpec(
            num_scalar_prefetch=0,
            grid=(num_tiles,),
            in_specs=[
                pl.BlockSpec((tile_b, obs_dim), lambda i: (i, 0)),  # obs tile (streamed)
                pl.BlockSpec((obs_dim, h0p), lambda i: (0, 0)),     # W1 (resident)
                pl.BlockSpec((1, h0p), lambda i: (0, 0)),           # b1
                pl.BlockSpec((h0p, h1p), lambda i: (0, 0)),         # W2 (resident)
                pl.BlockSpec((1, h1p), lambda i: (0, 0)),           # b2
                pl.BlockSpec((1, h1p), lambda i: (0, 0)),           # W3 stored as a row
                pl.BlockSpec(memory_space=pltpu.MemorySpace.SMEM),  # b3 scalar in SMEM
            ],
            out_specs=pl.BlockSpec((1, tile_b), lambda i: (i, 0)),  # lane-dense rows
        ),
        compiler_params=pltpu.CompilerParams(
            dimension_semantics=("parallel",),  # megacore sharding on v7x
        ),
        cost_estimate=cost,
    )(obs_c, w1_c, b1, w2_c, b2, w3_row, b3)

    return out2d.reshape(-1)[:B]  # drop batch padding; this is the .squeeze(-1)


def init_vnet_params(key, obs_dim, hidden=(256, 256), lane_pad=128):
    """Orthogonal(gain=1.41) weights, zero biases (matches weight_init).

    Weights are stored as (in_features, out_features) — transpose of
    nn.Linear — and hidden widths are zero-padded to multiples of `lane_pad`.
    W3 is stored as a (1, h1p) row for the VPU value head; b3 is a (1,) scalar.
    """
    gain = 1.41
    k1, k2, k3 = jax.random.split(key, 3)
    h0, h1 = hidden
    h0p, h1p = _round_up(h0, lane_pad), _round_up(h1, lane_pad)
    ortho = jax.nn.initializers.orthogonal(scale=gain)

    w1 = ortho(k1, (h0, obs_dim), jnp.float32).T                  # (obs_dim, h0)
    w2 = ortho(k2, (h1, h0), jnp.float32).T                       # (h0, h1)
    w3 = ortho(k3, (1, h1), jnp.float32)                          # (1, h1) row

    w1 = jnp.pad(w1, ((0, 0), (0, h0p - h0)))
    b1 = jnp.zeros((1, h0p), jnp.float32)
    w2 = jnp.pad(w2, ((0, h0p - h0), (0, h1p - h1)))
    b2 = jnp.zeros((1, h1p), jnp.float32)
    w3_row = jnp.pad(w3, ((0, 0), (0, h1p - h1)))
    b3 = jnp.zeros((1,), jnp.float32)
    return (w1, b1, w2, b2, w3_row, b3)


def vnet_forward_ref(obs, params, compute_dtype=jnp.float32):
    # Pure-JAX reference (same math, same compute dtype) for correctness checks.
    w1, b1, w2, b2, w3_row, b3 = params
    cd = compute_dtype
    h = jnp.dot(obs.astype(cd), w1.astype(cd), preferred_element_type=jnp.float32)
    h = jnp.maximum(h + b1, 0.0)
    h = jnp.dot(h.astype(cd), w2.astype(cd), preferred_element_type=jnp.float32)
    h = jnp.maximum(h + b2, 0.0)
    return jnp.sum(h * w3_row, axis=-1) + b3[0]


if __name__ == "__main__":
    key = jax.random.PRNGKey(0)
    kp, kx = jax.random.split(key)

    # Small shapes consistent with the module: batch=8, obs_dim=32, hidden=(64, 64)
    batch, obs_dim = 8, 32
    hidden = (64, 64)

    params = init_vnet_params(kp, obs_dim, hidden)
    obs = jax.random.normal(kx, (batch, obs_dim), jnp.float32)

    # f32 path: exact semantics of the PyTorch module.
    out_f32 = jax.block_until_ready(vnet_forward(obs, params, compute_dtype=jnp.float32))
    ref_f32 = vnet_forward_ref(obs, params, jnp.float32)
    assert out_f32.shape == (batch,), out_f32.shape
    assert jnp.allclose(out_f32, ref_f32, atol=1e-4, rtol=1e-4), (out_f32, ref_f32)

    # bf16-input path (recommended on v6e/v7x: halves the HBM-bound obs stream).
    out_bf16 = jax.block_until_ready(vnet_forward(obs, params, compute_dtype=jnp.bfloat16))
    ref_bf16 = vnet_forward_ref(obs, params, jnp.bfloat16)
    assert out_bf16.shape == (batch,), out_bf16.shape
    assert jnp.allclose(out_bf16, ref_bf16, atol=1e-3, rtol=1e-3), (out_bf16, ref_bf16)

    print("KERNEL_OK")
</pallas_src>

<mosaic_0001>
module attributes {stable_mosaic.version = 11 : i64} {
  func.func @_vnet_kernel(%arg0: i32, %arg1: memref<128x32xf32, #tpu.memory_space<vmem>>, %arg2: memref<32x128xf32, #tpu.memory_space<vmem>>, %arg3: memref<1x128xf32, #tpu.memory_space<vmem>>, %arg4: memref<128x128xf32, #tpu.memory_space<vmem>>, %arg5: memref<1x128xf32, #tpu.memory_space<vmem>>, %arg6: memref<1x128xf32, #tpu.memory_space<vmem>>, %arg7: memref<1xf32, #tpu.memory_space<smem>>, %arg8: memref<1x128xf32, #tpu.memory_space<vmem>>) attributes {dimension_semantics = [#tpu.dimension_semantics<parallel>], iteration_bounds = array<i64: 1>, scalar_prefetch = 0 : i64, scratch_operands = 0 : i64, tpu.core_type = #tpu.core_type<tc>, window_params = [{transform_indices = @transform_0, window_bounds = array<i64: 128, 32>}, {pipeline_mode = #tpu.pipeline_mode<synchronous>, transform_indices = @transform_1, window_bounds = array<i64: 32, 128>}, {pipeline_mode = #tpu.pipeline_mode<synchronous>, transform_indices = @transform_2, window_bounds = array<i64: 1, 128>}, {pipeline_mode = #tpu.pipeline_mode<synchronous>, transform_indices = @transform_3, window_bounds = array<i64: 128, 128>}, {pipeline_mode = #tpu.pipeline_mode<synchronous>, transform_indices = @transform_4, window_bounds = array<i64: 1, 128>}, {pipeline_mode = #tpu.pipeline_mode<synchronous>, transform_indices = @transform_5, window_bounds = array<i64: 1, 128>}, {transform_indices = @transform_6, window_bounds = array<i64: 1>}, {transform_indices = @transform_7, window_bounds = array<i64: 1, 128>}]} {
    %c0 = arith.constant 0 : index
    %c0_0 = arith.constant 0 : index
    %0 = vector.load %arg1[%c0, %c0_0] : memref<128x32xf32, #tpu.memory_space<vmem>>, vector<128x32xf32>
    %c0_1 = arith.constant 0 : index
    %c0_2 = arith.constant 0 : index
    %1 = vector.load %arg2[%c0_1, %c0_2] : memref<32x128xf32, #tpu.memory_space<vmem>>, vector<32x128xf32>
    %cst = arith.constant dense<0.000000e+00> : vector<128x128xf32>
    %2 = tpu.matmul %0, %1, %cst {dimension_numbers = #tpu.dot_dimension_numbers<[1], [0], [0], [1], [0, 0, 1, 1], [], []>} : vector<128x32xf32>, vector<32x128xf32>, vector<128x128xf32> -> vector<128x128xf32>
    %c0_3 = arith.constant 0 : index
    %c0_4 = arith.constant 0 : index
    %3 = vector.load %arg3[%c0_3, %c0_4] : memref<1x128xf32, #tpu.memory_space<vmem>>, vector<1x128xf32>
    %4 = vector.broadcast %3 : vector<1x128xf32> to vector<128x128xf32>
    %5 = arith.addf %2, %4 : vector<128x128xf32>
    %cst_5 = arith.constant 0.000000e+00 : f32
    %6 = vector.broadcast %cst_5 : f32 to vector<128x128xf32>
    %7 = arith.maximumf %5, %6 : vector<128x128xf32>
    %c0_6 = arith.constant 0 : index
    %c0_7 = arith.constant 0 : index
    %8 = vector.load %arg4[%c0_6, %c0_7] : memref<128x128xf32, #tpu.memory_space<vmem>>, vector<128x128xf32>
    %cst_8 = arith.constant dense<0.000000e+00> : vector<128x128xf32>
    %9 = tpu.matmul %7, %8, %cst_8 {dimension_numbers = #tpu.dot_dimension_numbers<[1], [0], [0], [1], [0, 0, 1, 1], [], []>} : vector<128x128xf32>, vector<128x128xf32>, vector<128x128xf32> -> vector<128x128xf32>
    %c0_9 = arith.constant 0 : index
    %c0_10 = arith.constant 0 : index
    %10 = vector.load %arg5[%c0_9, %c0_10] : memref<1x128xf32, #tpu.memory_space<vmem>>, vector<1x128xf32>
    %11 = vector.broadcast %10 : vector<1x128xf32> to vector<128x128xf32>
    %12 = arith.addf %9, %11 : vector<128x128xf32>
    %cst_11 = arith.constant 0.000000e+00 : f32
    %13 = vector.broadcast %cst_11 : f32 to vector<128x128xf32>
    %14 = arith.maximumf %12, %13 : vector<128x128xf32>
    %c0_12 = arith.constant 0 : index
    %c0_13 = arith.constant 0 : index
    %15 = vector.load %arg6[%c0_12, %c0_13] : memref<1x128xf32, #tpu.memory_space<vmem>>, vector<1x128xf32>
    %16 = vector.broadcast %15 : vector<1x128xf32> to vector<128x128xf32>
    %17 = arith.mulf %14, %16 : vector<128x128xf32>
    %cst_14 = arith.constant dense<0.000000e+00> : vector<128xf32>
    %18 = vector.multi_reduction <add>, %17, %cst_14 [1] : vector<128x128xf32> to vector<128xf32>
    %c0_15 = arith.constant 0 : index
    %19 = memref.load %arg7[%c0_15] : memref<1xf32, #tpu.memory_space<smem>>
    %20 = vector.broadcast %19 : f32 to vector<128xf32>
    %21 = arith.addf %18, %20 : vector<128xf32>
    %22 = vector.shape_cast %21 : vector<128xf32> to vector<1x128xf32>
    %c0_16 = arith.constant 0 : index
    %c0_17 = arith.constant 0 : index
    %23 = vector.load %arg8[%c0_16, %c0_17] : memref<1x128xf32, #tpu.memory_space<vmem>>, vector<1x128xf32>
    tpu.vector_store %arg8[%c0_16, %c0_17], %22 {strides = array<i32>} : memref<1x128xf32, #tpu.memory_space<vmem>>, vector<1x128xf32>,
    return
  }
  func.func @transform_0(%arg0: i32) -> (i32, i32) {
    %c0_i32 = arith.constant 0 : i32
    %c0_i32_0 = arith.constant 0 : i32
    return %arg0, %c0_i32 : i32, i32
  }
  func.func @transform_1(%arg0: i32) -> (i32, i32) {
    %c0_i32 = arith.constant 0 : i32
    %c0_i32_0 = arith.constant 0 : i32
    %c0_i32_1 = arith.constant 0 : i32
    return %c0_i32, %c0_i32_0 : i32, i32
  }
  func.func @transform_2(%arg0: i32) -> (i32, i32) {
    %c0_i32 = arith.constant 0 : i32
    %c0_i32_0 = arith.constant 0 : i32
    %c0_i32_1 = arith.constant 0 : i32
    return %c0_i32, %c0_i32_0 : i32, i32
  }
  func.func @transform_3(%arg0: i32) -> (i32, i32) {
    %c0_i32 = arith.constant 0 : i32
    %c0_i32_0 = arith.constant 0 : i32
    %c0_i32_1 = arith.constant 0 : i32
    return %c0_i32, %c0_i32_0 : i32, i32
  }
  func.func @transform_4(%arg0: i32) -> (i32, i32) {
    %c0_i32 = arith.constant 0 : i32
    %c0_i32_0 = arith.constant 0 : i32
    %c0_i32_1 = arith.constant 0 : i32
    return %c0_i32, %c0_i32_0 : i32, i32
  }
  func.func @transform_5(%arg0: i32) -> (i32, i32) {
    %c0_i32 = arith.constant 0 : i32
    %c0_i32_0 = arith.constant 0 : i32
    %c0_i32_1 = arith.constant 0 : i32
    return %c0_i32, %c0_i32_0 : i32, i32
  }
  func.func @transform_6(%arg0: i32) -> i32 {
    %c0_i32 = arith.constant 0 : i32
    %c0_i32_0 = arith.constant 0 : i32
    return %c0_i32 : i32
  }
  func.func @transform_7(%arg0: i32) -> (i32, i32) {
    %c0_i32 = arith.constant 0 : i32
    %c0_i32_0 = arith.constant 0 : i32
    return %arg0, %c0_i32 : i32, i32
  }
}

</mosaic_0001>

<bundles_post_ra>
// kernel: tpu_custom_call.1
= control target key start
LH: loop header
LB: loop body
LE: loop exit
PB: predicated region body
PF: predicated region fallthrough
CT: control target
= control target key end

     0   :  { %vm55_vm0 = vcmask 261120   ;;  %s1185_s0 = inlined_call_operand.vmem [shape: f32[128,32], index: 0, kind: input, shape index: {}]   ;;  %s1186_s1 = inlined_call_operand.vmem [shape: f32[32,128], index: 1, kind: input, shape index: {}]   ;;  %s1187_s2 = inlined_call_operand.vmem [shape: f32[1,128], index: 2, kind: input, shape index: {}]   ;;  %s1188_s3 = inlined_call_operand.vmem [shape: f32[128,128], index: 3, kind: input, shape index: {}]   ;;  %s1189_s4 = inlined_call_operand.vmem [shape: f32[1,128], index: 4, kind: input, shape index: {}]   ;;  %s1190_s5 = inlined_call_operand.vmem [shape: f32[1,128], index: 5, kind: input, shape index: {}]   ;;  %s1191_s6 = inlined_call_operand.<no memory space> [shape: f32[1], index: 6, kind: input, shape index: {}]   ;;  %s1192_s7 = inlined_call_operand.hbm [shape: f32[1,128], index: 7, kind: output, shape index: {}]  }
   0x1   :  { %v44_v0 = vld [vmem:[%s1186_s1] sm:$0xff]  ;;  %v45_v1 = vld [vmem:[%s1186_s1 + $0x8] sm:$0xff]  ;;  %v46_v2 = vld [vmem:[%s1186_s1 + $0x10] sm:$0xff] }
   0x2   :  { %v824_v3 = vpack.c.bf16 %v45_v1, %v44_v0  ;;  %v47_v4 = vld [vmem:[%s1186_s1 + $0x18] sm:$0xff]  ;;  %v28_v5 = vld [vmem:[%s1185_s0] sm:$0xff]  ;;  %v266_v8 = vld [vmem:[%s1188_s3 + $0x8] sm:$0xff] }
   0x3   :  { %v828_v6 = vpack.c.bf16 %v47_v4, %v46_v2  ;;  %744 = vmatprep.mubr.msk.f32.mxu0 %vm55_vm0, %v28_v5  ;;  %v265_v7 = vld [vmem:[%s1188_s3] sm:$0xff]  ;;  %v267_v9 = vld [vmem:[%s1188_s3 + $0x10] sm:$0xff]  ;;  %v268_v10 = vld [vmem:[%s1188_s3 + $0x18] sm:$0xff] }
   0x4   :  { %825 = vmatprep.subr.bf16.mxu0 %v824_v3  ;;  %v29_v11 = vld [vmem:[%s1185_s0 + $0x8] sm:$0xff]  ;;  %v832_v12 = vpack.c.bf16 %v266_v8, %v265_v7  ;;  %v30_v13 = vld [vmem:[%s1185_s0 + $0x10] sm:$0xff]  ;;  %v836_v14 = vpack.c.bf16 %v268_v10, %v267_v9  ;;  %v269_v15 = vld [vmem:[%s1188_s3 + $0x20] sm:$0xff] }
   0x5   :  { %827 = vmatpush3.bf16.msra.mxu0 %v824_v3  ;;  %v270_v16 = vld [vmem:[%s1188_s3 + $0x28] sm:$0xff] }
   0x6   :  { %829 = vmatprep.subr.bf16.mxu0 %v828_v6  ;;  %864 = vmatprep.subr.bf16.mxu1 %v832_v12 }
   0x7   :  { %872 = vmatpush3.bf16.msra.mxu1 %v832_v12 }
   0x9   :  { %831 = vmatpush3.bf16.msra.mxu0 %v828_v6 }
   0xa   :  { %833 = vmatprep.subr.bf16.mxu0 %v832_v12 }
   0xc   :  { %745 = vmatmul.mubr.msk.f32.vlgmr.msra.gmra.mrb[0].mxu0 %vm55_vm0, %v29_v11 }
   0xd   :  { %13 = vsyncpa [#allocation4], 0  ;;  %747 = vmatprep.mubr.msk.f32.mxu0 %vm55_vm0, %v30_v13  ;;  %v31_v17 = vld [vmem:[%s1185_s0 + $0x18] sm:$0xff]  ;;  %835 = vmatpush3.bf16.msra.mxu0 %v832_v12  ;;  %v32_v18 = vld [vmem:[%s1185_s0 + $0x20] sm:$0xff]  ;;  %v840_v19 = vpack.c.bf16 %v270_v16, %v269_v15  ;;  %vm549_vm1 = vcmask 130112   ;;  %vm556_vm2 = vcmask 195712  }
   0xe   :  { %837 = vmatprep.subr.bf16.mxu0 %v836_v14  ;;  %865 = vmatprep.subr.bf16.mxu1 %v836_v14  ;;  %v271_v20 = vld [vmem:[%s1188_s3 + $0x30] sm:$0xff]  ;;  %v272_v21 = vld [vmem:[%s1188_s3 + $0x38] sm:$0xff]  ;;  %v33_v22 = vld [vmem:[%s1185_s0 + $0x28] sm:$0xff]  ;;  %vm563_vm3 = vcmask 261312   ;;  %vm570_vm4 = vcmask 326912   ;;  %vm577_vm5 = vcmask 392512  }
   0xf   :  { %873 = vmatpush3.bf16.msra.mxu1 %v836_v14  ;;  %v34_v23 = vld [vmem:[%s1185_s0 + $0x30] sm:$0xff]  ;;  %v844_v24 = vpack.c.bf16 %v272_v21, %v271_v20  ;;  %v273_v25 = vld [vmem:[%s1188_s3 + $0x40] sm:$0xff]  ;;  %v274_v26 = vld [vmem:[%s1188_s3 + $0x48] sm:$0xff]  ;;  %vm584_vm6 = vcmask 458112   ;;  %vm591_vm7 = vcmask 523712   ;;  %vm598_vm8 = vcmask 589312  }
  0x10   :  { %748 = vmatmul.mubr.msk.f32.gmra.mrb[2].mxu0 %vm55_vm0, %v31_v17  ;;  %866 = vmatprep.subr.bf16.mxu1 %v840_v19  ;;  %v35_v27 = vld [vmem:[%s1185_s0 + $0x38] sm:$0xff]  ;;  %v36_v28 = vld [vmem:[%s1185_s0 + $0x40] sm:$0xff]  ;;  %v848_v29 = vpack.c.bf16 %v274_v26, %v273_v25  ;;  %v275_v30 = vld [vmem:[%s1188_s3 + $0x50] sm:$0xff]  ;;  %vm605_vm9 = vcmask 654912   ;;  %vm612_vm10 = vcmask 720512   ;;  %vm619_vm11 = vcmask 786112  }
  0x11   :  { %750 = vmatprep.mubr.msk.f32.mxu0 %vm55_vm0, %v32_v18  ;;  %839 = vmatpush3.bf16.msra.mxu0 %v836_v14  ;;  %v276_v31 = vld [vmem:[%s1188_s3 + $0x58] sm:$0xff]  ;;  %v37_v32 = vld [vmem:[%s1185_s0 + $0x48] sm:$0xff]  ;;  %v38_v33 = vld [vmem:[%s1185_s0 + $0x50] sm:$0xff]  ;;  %vm626_vm12 = vcmask 851712   ;;  %vm633_vm13 = vcmask 917312   ;;  %vm640_vm14 = vcmask 982912  }
  0x12   :  { %841 = vmatprep.subr.bf16.mxu0 %v840_v19  ;;  %v852_v34 = vpack.c.bf16 %v276_v31, %v275_v30  ;;  %v277_v35 = vld [vmem:[%s1188_s3 + $0x60] sm:$0xff]  ;;  %v278_v36 = vld [vmem:[%s1188_s3 + $0x68] sm:$0xff]  ;;  %v39_v37 = vld [vmem:[%s1185_s0 + $0x58] sm:$0xff]  ;;  %vm647_vm15 = vcmask 1048512  }
  0x13   :  { %874 = vmatpush3.bf16.msra.mxu1 %v840_v19  ;;  %v40_v38 = vld [vmem:[%s1185_s0 + $0x60] sm:$0xff]  ;;  %v856_v39 = vpack.c.bf16 %v278_v36, %v277_v35  ;;  %v41_v40 = vld [vmem:[%s1185_s0 + $0x68] sm:$0xff]  ;;  %v42_v41 = vld [vmem:[%s1185_s0 + $0x70] sm:$0xff] }
  0x14   :  { %751 = vmatmul.mubr.msk.f32.gmra.mrb[4].mxu0 %vm55_vm0, %v33_v22  ;;  %867 = vmatprep.subr.bf16.mxu1 %v844_v24  ;;  %v43_v42 = vld [vmem:[%s1185_s0 + $0x78] sm:$0xff]  ;;  %v279_v43 = vld [vmem:[%s1188_s3 + $0x70] sm:$0xff]  ;;  %v665_v46 = vld [vmem:[%s1187_s2] ss:$0 sm:$0xff] }
  0x15   :  { %753 = vmatprep.mubr.msk.f32.mxu0 %vm55_vm0, %v34_v23  ;;  %843 = vmatpush3.bf16.msra.mxu0 %v840_v19  ;;  %v280_v44 = vld [vmem:[%s1188_s3 + $0x78] sm:$0xff]  ;;  %v1076_v31 = vld [vmem:[%s1189_s4] ss:$0 sm:$0xff] }
  0x16   :  { %845 = vmatprep.subr.bf16.mxu0 %v844_v24  ;;  %v860_v45 = vpack.c.bf16 %v280_v44, %v279_v43  ;;  %v1083_v36 = vld [vmem:[%s1190_s5] ss:$0 sm:$0xff] }
  0x17   :  { %875 = vmatpush3.bf16.msra.mxu1 %v844_v24 }
  0x18   :  { %754 = vmatmul.mubr.msk.f32.gmra.mrb[6].mxu0 %vm55_vm0, %v35_v27  ;;  %868 = vmatprep.subr.bf16.mxu1 %v848_v29 }
  0x19   :  { %756 = vmatprep.mubr.msk.f32.mxu0 %vm55_vm0, %v36_v28  ;;  %847 = vmatpush3.bf16.msra.mxu0 %v844_v24 }
  0x1a   :  { %849 = vmatprep.subr.bf16.mxu0 %v848_v29 }
  0x1b   :  { %876 = vmatpush3.bf16.msra.mxu1 %v848_v29 }
  0x1c   :  { %757 = vmatmul.mubr.msk.f32.gmra.mrb[8].mxu0 %vm55_vm0, %v37_v32  ;;  %869 = vmatprep.subr.bf16.mxu1 %v852_v34 }
  0x1d   :  { %759 = vmatprep.mubr.msk.f32.mxu0 %vm55_vm0, %v38_v33  ;;  %851 = vmatpush3.bf16.msra.mxu0 %v848_v29 }
  0x1e   :  { %853 = vmatprep.subr.bf16.mxu0 %v852_v34 }
  0x1f   :  { %877 = vmatpush3.bf16.msra.mxu1 %v852_v34 }
  0x20   :  { %760 = vmatmul.mubr.msk.f32.gmra.mrb[10].mxu0 %vm55_vm0, %v39_v37  ;;  %870 = vmatprep.subr.bf16.mxu1 %v856_v39 }
  0x21   :  { %762 = vmatprep.mubr.msk.f32.mxu0 %vm55_vm0, %v40_v38  ;;  %855 = vmatpush3.bf16.msra.mxu0 %v852_v34 }
  0x22   :  { %857 = vmatprep.subr.bf16.mxu0 %v856_v39 }
  0x23   :  { %878 = vmatpush3.bf16.msra.mxu1 %v856_v39 }
  0x24   :  { %763 = vmatmul.mubr.msk.f32.gmra.mrb[12].mxu0 %vm55_vm0, %v41_v40  ;;  %871 = vmatprep.subr.bf16.mxu1 %v860_v45 }
  0x25   :  { %765 = vmatprep.mubr.msk.f32.mxu0 %vm55_vm0, %v42_v41  ;;  %859 = vmatpush3.bf16.msra.mxu0 %v856_v39 }
  0x26   :  { %861 = vmatprep.subr.bf16.mxu0 %v860_v45 }
  0x27   :  { %879 = vmatpush3.bf16.msra.mxu1 %v860_v45 }
  0x28   :  { %766 = vmatmul.mubr.msk.f32.gmra.mrb[14].mxu0 %vm55_vm0, %v43_v42 }
  0x29   :  { %863 = vmatpush3.bf16.msra.mxu0 %v860_v45 }
  0xdf   :  { %v746_v47 = vpop.f32.mrb[0].mxu0 }
  0xe0   :  { %v176_v48 = vadd.f32 %v746_v47, %v665_v46  ;;  %v170_v49 = vpop.f32.mrb[1].mxu0 }
  0xe1   :  { %v171_v50 = vadd.f32 %v665_v46, %v170_v49 }
  0xe2   :  { %v250_v53 = vmax.f32 %v176_v48, 0.0 }
  0xe3   :  { %v249_v51 = vmax.f32 %v171_v50, 0.0  ;;  %v749_v52 = vpop.f32.mrb[2].mxu0 }
  0xe4   :  { %v186_v54 = vadd.f32 %v749_v52, %v665_v46  ;;  %v180_v55 = vpop.f32.mrb[3].mxu0 }
  0xe5   :  { %v181_v56 = vadd.f32 %v665_v46, %v180_v55  ;;  %800 = vmatprep.mubr.f32.mxu0 %v249_v51 }
  0xe6   :  { %801 = vmatmul.mubr.f32.vlgmr.msra.gmra.mrb[16].mxu0 %v250_v53  ;;  %v252_v59 = vmax.f32 %v186_v54, 0.0 }
  0xe7   :  { %v251_v57 = vmax.f32 %v181_v56, 0.0  ;;  %v752_v58 = vpop.f32.mrb[4].mxu0 }
  0xe8   :  { %v196_v60 = vadd.f32 %v752_v58, %v665_v46  ;;  %v190_v61 = vpop.f32.mrb[5].mxu0 }
  0xe9   :  { %v191_v62 = vadd.f32 %v665_v46, %v190_v61  ;;  %803 = vmatprep.mubr.f32.mxu0 %v251_v57 }
  0xea   :  { %v254_v63 = vmax.f32 %v196_v60, 0.0  ;;  %804 = vmatmul.mubr.f32.gmra.mrb[18].mxu0 %v252_v59 }
  0xeb   :  { %v253_v0 = vmax.f32 %v191_v62, 0.0  ;;  %v755_v1 = vpop.f32.mrb[6].mxu0 }
  0xec   :  { %v206_v2 = vadd.f32 %v755_v1, %v665_v46  ;;  %v200_v3 = vpop.f32.mrb[7].mxu0 }
  0xed   :  { %806 = vmatprep.mubr.f32.mxu0 %v253_v0  ;;  %v201_v4 = vadd.f32 %v665_v46, %v200_v3 }
  0xee   :  { %v256_v5 = vmax.f32 %v206_v2, 0.0  ;;  %807 = vmatmul.mubr.f32.gmra.mrb[20].mxu0 %v254_v63 }
  0xef   :  { %v758_v6 = vpop.f32.mrb[8].mxu0  ;;  %v255_v7 = vmax.f32 %v201_v4, 0.0 }
  0xf0   :  { %v216_v8 = vadd.f32 %v758_v6, %v665_v46  ;;  %v210_v9 = vpop.f32.mrb[9].mxu0 }
  0xf1   :  { %v211_v10 = vadd.f32 %v665_v46, %v210_v9  ;;  %809 = vmatprep.mubr.f32.mxu1 %v255_v7 }
  0xf2   :  { %v258_v11 = vmax.f32 %v216_v8, 0.0  ;;  %810 = vmatmul.mubr.f32.vlgmr.msra.gmra.mrb[0].mxu1 %v256_v5 }
  0xf3   :  { %v257_v12 = vmax.f32 %v211_v10, 0.0  ;;  %v761_v13 = vpop.f32.mrb[10].mxu0 }
  0xf4   :  { %v226_v14 = vadd.f32 %v761_v13, %v665_v46  ;;  %v220_v15 = vpop.f32.mrb[11].mxu0 }
  0xf5   :  { %v221_v16 = vadd.f32 %v665_v46, %v220_v15  ;;  %812 = vmatprep.mubr.f32.mxu1 %v257_v12 }
  0xf6   :  { %v260_v17 = vmax.f32 %v226_v14, 0.0  ;;  %813 = vmatmul.mubr.f32.gmra.mrb[2].mxu1 %v258_v11 }
  0xf7   :  { %v259_v18 = vmax.f32 %v221_v16, 0.0  ;;  %v764_v19 = vpop.f32.mrb[12].mxu0 }
  0xf8   :  { %v236_v20 = vadd.f32 %v764_v19, %v665_v46  ;;  %v230_v21 = vpop.f32.mrb[13].mxu0 }
  0xf9   :  { %v231_v22 = vadd.f32 %v665_v46, %v230_v21  ;;  %815 = vmatprep.mubr.f32.mxu1 %v259_v18 }
  0xfa   :  { %v262_v23 = vmax.f32 %v236_v20, 0.0  ;;  %816 = vmatmul.mubr.f32.gmra.mrb[4].mxu1 %v260_v17 }
  0xfb   :  { %v261_v24 = vmax.f32 %v231_v22, 0.0  ;;  %v767_v25 = vpop.f32.mrb[14].mxu0 }
  0xfc   :  { %v246_v26 = vadd.f32 %v767_v25, %v665_v46  ;;  %v240_v27 = vpop.f32.mrb[15].mxu0 }
  0xfd   :  { %v241_v28 = vadd.f32 %v665_v46, %v240_v27  ;;  %818 = vmatprep.mubr.f32.mxu1 %v261_v24 }
  0xfe   :  { %v264_v29 = vmax.f32 %v246_v26, 0.0  ;;  %819 = vmatmul.mubr.f32.gmra.mrb[6].mxu1 %v262_v23 }
  0xff   :  { %v263_v30 = vmax.f32 %v241_v28, 0.0 }
 0x101   :  { %821 = vmatprep.mubr.f32.mxu1 %v263_v30 }
 0x102   :  { %822 = vmatmul.mubr.f32.gmra.mrb[8].mxu1 %v264_v29 }
 0x1b9   :  { %v802_v32 = vpop.f32.mrb[16].mxu0 }
 0x1ba   :  { %v360_v33 = vadd.f32 %v802_v32, %v1076_v31  ;;  %v354_v34 = vpop.f32.mrb[17].mxu0 }
 0x1bb   :  { %v355_v35 = vadd.f32 %v1076_v31, %v354_v34  ;;  %v538_v34 = vlaneseq }
 0x1bc   :  { %v434_v37 = vmax.f32 %v360_v33, 0.0 }
 0x1bd   :  { %v805_v38 = vpop.f32.mrb[18].mxu0  ;;  %v433_v39 = vmax.f32 %v355_v35, 0.0  ;;  %v1115_v35 = vand.u32 127, %v538_v34 }
 0x1be   :  { %v370_v40 = vadd.f32 %v805_v38, %v1076_v31  ;;  %v364_v41 = vpop.f32.mrb[19].mxu0  ;;  %v457_v42 = vmul.f32 %v1083_v36, %v434_v37 }
 0x1bf   :  { %v365_v43 = vadd.f32 %v1076_v31, %v364_v41  ;;  %v456_v50 = vmul.f32 %v1083_v36, %v433_v39  ;;  %v544_v38 = vadd.s32 4294967288, %v1115_v35  ;;  %v1123_v39 = vstv %s1191_s6  ;;  %s905_s6 = smov [#allocation3]  }
 0x1c0   :  { %v436_v44 = vmax.f32 %v370_v40, 0.0  ;;  %474 = vadd.xlane.f32.xlu0 %v457_v42  ;;  %v551_v40 = vadd.s32 4294967280, %v1115_v35  ;;  %v558_v41 = vadd.s32 4294967272, %v1115_v35  ;;  %s657_s27 = sshll.u32 %s905_s6, 4  ;;  %s658_s27 = int_to_ptr.vmem [resolvable:$true] %s657_s27 }
 0x1c1   :  { %v808_v45 = vpop.f32.mrb[20].mxu0  ;;  %v435_v46 = vmax.f32 %v365_v43, 0.0  ;;  %s881_s28 = scalar_lea.vmem %s658_s27, 16  ;;  %s885_s29 = scalar_lea.vmem %s658_s27, 32 }
 0x1c2   :  { %v380_v47 = vadd.f32 %v808_v45, %v1076_v31  ;;  %v374_v48 = vpop.f32.mrb[21].mxu0  ;;  %v459_v49 = vmul.f32 %v1083_v36, %v436_v44  ;;  %v565_v44 = vadd.s32 4294967264, %v1115_v35  ;;  %p882_p0 = scmp.ne.s32.totalorder %s658_s27, %s881_s28  ;;  %p886_p1 = scmp.lt.s32.totalorder %s658_s27, %s658_s27 }
 0x1c3   :  { %v375_v51 = vadd.f32 %v1076_v31, %v374_v48  ;;  %v458_v57 = vmul.f32 %v1083_v36, %v435_v46  ;;  %v572_v48 = vadd.s32 4294967256, %v1115_v35  ;;  %p887_p2 = scmp.lt.s32.totalorder %s885_s29, %s881_s28 }
 0x1c4   :  { %478 = vadd.xlane.f32.xlu1 %v459_v49  ;;  %472 = vadd.xlane.f32.xlu0 %v456_v50  ;;  %v438_v54 = vmax.f32 %v380_v47, 0.0  ;;  %v579_v50 = vadd.s32 4294967248, %v1115_v35 }
 0x1c5   :  { %v437_v52 = vmax.f32 %v375_v51, 0.0  ;;  %v811_v53 = vpop.f32.mrb[0].mxu1  ;;  %p888_p3 = por %p887_p2, %p886_p1 }
 0x1c6   :  { %v390_v55 = vadd.f32 %v811_v53, %v1076_v31  ;;  %v384_v56 = vpop.f32.mrb[1].mxu1  ;;  %v461_v1 = vmul.f32 %v1083_v36, %v438_v54 }
 0x1c7   :  { %v385_v58 = vadd.f32 %v1076_v31, %v384_v56  ;;  %v460_v59 = vmul.f32 %v1083_v36, %v437_v52  ;;  %p889_p4 = pnand %p888_p3, %p882_p0 }
 0x1c8   :  { %476 = vadd.xlane.f32.xlu1 %v458_v57  ;;  %v440_v62 = vmax.f32 %v390_v55, 0.0 }
 0x1c9   :  { %v439_v60 = vmax.f32 %v385_v58, 0.0  ;;  %v814_v61 = vpop.f32.mrb[2].mxu1  ;;  %480 = vadd.xlane.f32.xlu0 %v460_v59 }
 0x1ca   :  { %v400_v63 = vadd.f32 %v814_v61, %v1076_v31  ;;  %v394_v0 = vpop.f32.mrb[3].mxu1  ;;  %v463_v9 = vmul.f32 %v1083_v36, %v440_v62 }
 0x1cb   :  { %v395_v2 = vadd.f32 %v1076_v31, %v394_v0  ;;  %v462_v3 = vmul.f32 %v1083_v36, %v439_v60 }
 0x1cc   :  { %482 = vadd.xlane.f32.xlu1 %v461_v1  ;;  %v442_v6 = vmax.f32 %v400_v63, 0.0  ;;  %v586_v63 = vadd.s32 4294967240, %v1115_v35 }
 0x1cd   :  { %v441_v4 = vmax.f32 %v395_v2, 0.0  ;;  %v817_v5 = vpop.f32.mrb[4].mxu1  ;;  %484 = vadd.xlane.f32.xlu0 %v462_v3 }
 0x1ce   :  { %v410_v7 = vadd.f32 %v817_v5, %v1076_v31  ;;  %v404_v8 = vpop.f32.mrb[5].mxu1  ;;  %v465_v17 = vmul.f32 %v1083_v36, %v442_v6 }
 0x1cf   :  { %v405_v10 = vadd.f32 %v1076_v31, %v404_v8  ;;  %v464_v11 = vmul.f32 %v1083_v36, %v441_v4  ;;  %v593_v4 = vadd.s32 4294967232, %v1115_v35 }
 0x1d0   :  { %486 = vadd.xlane.f32.xlu1 %v463_v9  ;;  %v444_v14 = vmax.f32 %v410_v7, 0.0 }
 0x1d1   :  { %v443_v12 = vmax.f32 %v405_v10, 0.0  ;;  %v820_v13 = vpop.f32.mrb[6].mxu1  ;;  %488 = vadd.xlane.f32.xlu0 %v464_v11 }
 0x1d2   :  { %v420_v15 = vadd.f32 %v820_v13, %v1076_v31  ;;  %v414_v16 = vpop.f32.mrb[7].mxu1  ;;  %v467_v25 = vmul.f32 %v1083_v36, %v444_v14  ;;  %v600_v13 = vadd.s32 4294967224, %v1115_v35 }
 0x1d3   :  { %v415_v18 = vadd.f32 %v1076_v31, %v414_v16  ;;  %v466_v19 = vmul.f32 %v1083_v36, %v443_v12 }
 0x1d4   :  { %490 = vadd.xlane.f32.xlu1 %v465_v17  ;;  %v446_v22 = vmax.f32 %v420_v15, 0.0  ;;  %v607_v17 = vadd.s32 4294967216, %v1115_v35 }
 0x1d5   :  { %v445_v20 = vmax.f32 %v415_v18, 0.0  ;;  %v823_v21 = vpop.f32.mrb[8].mxu1  ;;  %492 = vadd.xlane.f32.xlu0 %v466_v19 }
 0x1d6   :  { %v430_v23 = vadd.f32 %v823_v21, %v1076_v31  ;;  %v424_v24 = vpop.f32.mrb[9].mxu1  ;;  %v469_v30 = vmul.f32 %v1083_v36, %v446_v22 }
 0x1d7   :  { %v425_v26 = vadd.f32 %v1076_v31, %v424_v24  ;;  %v468_v27 = vmul.f32 %v1083_v36, %v445_v20  ;;  %v1117_v31 = vshrl.u32 %v538_v34, 7  ;;  %v614_v24 = vadd.s32 4294967208, %v1115_v35 }
 0x1d8   :  { %494 = vadd.xlane.f32.xlu1 %v467_v25  ;;  %v448_v29 = vmax.f32 %v430_v23, 0.0 }
 0x1d9   :  { %v447_v28 = vmax.f32 %v425_v26, 0.0  ;;  %496 = vadd.xlane.f32.xlu0 %v468_v27  ;;  %v547_v46 = vsub.s32 %v544_v38, %v1117_v31  ;;  %v554_v49 = vsub.s32 %v551_v40, %v1117_v31  ;;  %v561_v51 = vsub.s32 %v558_v41, %v1117_v31 }
 0x1da   :  { %v471_v33 = vmul.f32 %v1083_v36, %v448_v29  ;;  %v568_v55 = vsub.s32 %v565_v44, %v1117_v31  ;;  %v575_v60 = vsub.s32 %v572_v48, %v1117_v31  ;;  %v582_v62 = vsub.s32 %v579_v50, %v1117_v31 }
 0x1db   :  { %v470_v32 = vmul.f32 %v1083_v36, %v447_v28  ;;  %v542_v36 = vsub.s32 %v1115_v35, %v1117_v31  ;;  %v589_v12 = vsub.s32 %v586_v63, %v1117_v31  ;;  %v596_v16 = vsub.s32 %v593_v4, %v1117_v31 }
 0x1dc   :  { %498 = vadd.xlane.f32.xlu1 %v469_v30  ;;  %v603_v23 = vsub.s32 %v600_v13, %v1117_v31  ;;  %v610_v28 = vsub.s32 %v607_v17, %v1117_v31  ;;  %v621_v29 = vadd.s32 4294967200, %v1115_v35  ;;  %v617_v38 = vsub.s32 %v614_v24, %v1117_v31 }
 0x1dd   :  { %500 = vadd.xlane.f32.xlu0 %v470_v32  ;;  %v628_v40 = vadd.s32 4294967192, %v1115_v35  ;;  %v635_v44 = vadd.s32 4294967184, %v1115_v35 }
 0x1df   :  { %v631_v50 = vsub.s32 %v628_v40, %v1117_v31 }
 0x1e0   :  { %502 = vadd.xlane.f32.xlu1 %v471_v33 }
 0x24d   :  { %v475_v37 = vpop.xlane.xlu0 %474 }
 0x24e   :  { %v507_v47 = vadd.f32 %v1123_v39, %v475_v37 }
 0x250   :  { %v548_v58 = vrot.slane %v507_v47, %v547_v46 }
 0x251   :  { %v479_v42 = vpop.xlane.xlu1 %478  ;;  %v473_v43 = vpop.xlane.xlu0 %472 }
 0x252   :  { %v506_v45 = vadd.f32 %v1123_v39, %v473_v43  ;;  %v509_v52 = vadd.f32 %v1123_v39, %v479_v42  ;;  %v624_v43 = vsub.s32 %v621_v29, %v1117_v31 }
 0x254   :  { %v543_v53 = vrot.slane %v506_v45, %v542_v36  ;;  %v562_v0 = vrot.slane %v509_v52, %v561_v51  ;;  %v642_v51 = vadd.s32 4294967176, %v1115_v35 }
 0x255   :  { %v477_v54 = vpop.xlane.xlu1 %476 }
 0x256   :  { %v508_v56 = vadd.f32 %v1123_v39, %v477_v54  ;;  %v481_v57 = vpop.xlane.xlu0 %480  ;;  %v550_v1 = vsel %vm549_vm1, %v548_v58, %v543_v53 }
 0x257   :  { %v510_v59 = vadd.f32 %v1123_v39, %v481_v57 }
 0x258   :  { %v555_v61 = vrot.slane %v508_v56, %v554_v49 }
 0x259   :  { %v569_v2 = vrot.slane %v510_v59, %v568_v55  ;;  %v483_v3 = vpop.xlane.xlu1 %482  ;;  %v638_v55 = vsub.s32 %v635_v44, %v1117_v31 }
 0x25a   :  { %v557_v5 = vsel %vm556_vm2, %v555_v61, %v550_v1  ;;  %v511_v6 = vadd.f32 %v1123_v39, %v483_v3  ;;  %v485_v7 = vpop.xlane.xlu0 %484  ;;  %v645_v61 = vsub.s32 %v642_v51, %v1117_v31 }
 0x25b   :  { %v564_v8 = vsel %vm563_vm3, %v562_v0, %v557_v5  ;;  %v512_v9 = vadd.f32 %v1123_v39, %v485_v7 }
 0x25c   :  { %v571_v10 = vsel %vm570_vm4, %v569_v2, %v564_v8  ;;  %v576_v11 = vrot.slane %v511_v6, %v575_v60 }
 0x25d   :  { %v583_v14 = vrot.slane %v512_v9, %v582_v62  ;;  %v487_v15 = vpop.xlane.xlu1 %486 }
 0x25e   :  { %v578_v18 = vsel %vm577_vm5, %v576_v11, %v571_v10  ;;  %v513_v19 = vadd.f32 %v1123_v39, %v487_v15  ;;  %v489_v20 = vpop.xlane.xlu0 %488 }
 0x25f   :  { %v514_v21 = vadd.f32 %v1123_v39, %v489_v20  ;;  %v585_v25 = vsel %vm584_vm6, %v583_v14, %v578_v18 }
 0x260   :  { %v590_v22 = vrot.slane %v513_v19, %v589_v12 }
 0x261   :  { %v597_v26 = vrot.slane %v514_v21, %v596_v16  ;;  %v491_v27 = vpop.xlane.xlu1 %490 }
 0x262   :  { %v592_v30 = vsel %vm591_vm7, %v590_v22, %v585_v25  ;;  %v515_v32 = vadd.f32 %v1123_v39, %v491_v27  ;;  %v493_v33 = vpop.xlane.xlu0 %492 }
 0x263   :  { %v516_v34 = vadd.f32 %v1123_v39, %v493_v33  ;;  %v599_v41 = vsel %vm598_vm8, %v597_v26, %v592_v30 }
 0x264   :  { %v604_v37 = vrot.slane %v515_v32, %v603_v23 }
 0x265   :  { %v611_v42 = vrot.slane %v516_v34, %v610_v28  ;;  %v495_v36 = vpop.xlane.xlu1 %494 }
 0x266   :  { %v606_v45 = vsel %vm605_vm9, %v604_v37, %v599_v41  ;;  %v517_v46 = vadd.f32 %v1123_v39, %v495_v36  ;;  %v497_v47 = vpop.xlane.xlu0 %496 }
 0x267   :  { %v518_v48 = vadd.f32 %v1123_v39, %v497_v47  ;;  %v613_v52 = vsel %vm612_vm10, %v611_v42, %v606_v45 }
 0x268   :  { %v618_v49 = vrot.slane %v517_v46, %v617_v38 }
 0x269   :  { %v625_v53 = vrot.slane %v518_v48, %v624_v43  ;;  %v499_v54 = vpop.xlane.xlu1 %498 }
 0x26a   :  { %v620_v56 = vsel %vm619_vm11, %v618_v49, %v613_v52  ;;  %v519_v57 = vadd.f32 %v1123_v39, %v499_v54  ;;  %v501_v58 = vpop.xlane.xlu0 %500 }
 0x26b   :  { %v520_v59 = vadd.f32 %v1123_v39, %v501_v58  ;;  %v627_v62 = vsel %vm626_vm12, %v625_v53, %v620_v56 }
 0x26c   :  { %v632_v60 = vrot.slane %v519_v57, %v631_v50 }
 0x26d   :  { %v639_v63 = vrot.slane %v520_v59, %v638_v55  ;;  %v503_v0 = vpop.xlane.xlu1 %502 }
 0x26e   :  { %v521_v35 = vadd.f32 %v1123_v39, %v503_v0  ;;  %v634_v1 = vsel %vm633_vm13, %v632_v60, %v627_v62 }
 0x26f   :  { %v641_v3 = vsel %vm640_vm14, %v639_v63, %v634_v1 }
 0x270   :  { %v646_v2 = vrot.slane %v521_v35, %v645_v61 }
 0x272   :  { %v648_v4 = vsel %vm647_vm15, %v646_v2, %v641_v3 }
 0x273   :  { %650 = vst [vmem:[#allocation3] sm:$0x1] %v648_v4 }
 0x274   :  { %892 = shalt.err (!%p889_p4)
}
 0x275   :  { %s893_s9 = scalar_lea.hbm %s1192_s7, 16 }
 0x276   :  { %p894_p5 = scmp.ne.s32.totalorder %s1192_s7, %s893_s9  ;;  %p897_p6 = scmp.lt.u32.totalorder %s893_s9, %s1192_s7 }
 0x278   :  { %p899_p7 = pnand %p897_p6, %p894_p5 }
 0x27a   :  { %902 = shalt.err (!%p899_p7)
}
 0x27b   :  { %660 = dma.vmem_to_hbm [thread:$0]  %s658_s27, 16, %s1192_s7, [#allocation4]  }
 0x27c   :  { %903 = dma.done.wait [#allocation4], 16  }
 0x27d   :  { %904 = vsyncadd [#allocation4], 4294967280 }
 0x27e   :  { %664 = vsyncpa [#allocation4], 1 }

</bundles_post_ra>
